<compile_context>
chip_gen: v7x
topology: tpu7x:2x2x1
jax: 0.10.0
libtpu: 0.0.40
codegen_flags: <defaults>
</compile_context>

<pallas_src>
import jax
import jax.numpy as jnp
from jax.experimental import pallas as pl
from jax.experimental.pallas import tpu as pltpu


# ----------------------------------------------------------------------------
# Kernels
# ----------------------------------------------------------------------------
def gcn_layer_kernel(a_ref, h_ref, w_ref, b_ref, o_ref, acc_ref):
    """One GCNConv layer: o = relu((A_hat @ h) @ W + b), tiled over A columns."""
    k = pl.program_id(1)

    @pl.when(k == 0)
    def _():
        acc_ref[...] = jnp.zeros_like(acc_ref)

    # bf16 x bf16 -> f32 accumulate on the MXU.
    acc_ref[...] += jnp.dot(a_ref[...], h_ref[...],
                            preferred_element_type=jnp.float32)

    @pl.when(k == pl.num_programs(1) - 1)
    def _():
        z = jnp.dot(acc_ref[...].astype(jnp.bfloat16), w_ref[...],
                    preferred_element_type=jnp.float32) + b_ref[...]
        o_ref[...] = jnp.maximum(z, 0.0).astype(o_ref.dtype)


def gcn_layer_head_kernel(a_ref, h_ref, w2_ref, b2_ref, w3_ref, b3_ref,
                          o_ref, acc_ref):
    """Layer 2 + fused Linear head: out = relu((A_hat@h1)@W2 + b2) @ W3 + b3."""
    k = pl.program_id(1)

    @pl.when(k == 0)
    def _():
        acc_ref[...] = jnp.zeros_like(acc_ref)

    acc_ref[...] += jnp.dot(a_ref[...], h_ref[...],
                            preferred_element_type=jnp.float32)

    @pl.when(k == pl.num_programs(1) - 1)
    def _():
        h2 = jnp.dot(acc_ref[...].astype(jnp.bfloat16), w2_ref[...],
                     preferred_element_type=jnp.float32) + b2_ref[...]
        h2 = jnp.maximum(h2, 0.0)
        # Fused Linear(hidden, 1) head; b3 is an SMEM scalar.
        # TODO(synk): the [tm, 1] output is a lane-width-1 (masked) store; for
        # large batched runs a lane-dense padded output buffer would be better.
        out = jnp.dot(h2.astype(jnp.bfloat16), w3_ref[...],
                      preferred_element_type=jnp.float32) + b3_ref[0]
        o_ref[...] = out.astype(o_ref.dtype)


# ----------------------------------------------------------------------------
# pallas_call wrappers
# ----------------------------------------------------------------------------
_VMEM_LIMIT = 32 * 1024 * 1024  # safe on v5e/v6e/v7x (v7x physical = 64 MiB)


def _gcn_layer_call(a_hat, h, w, b, *, tm, tk, out_dtype):
    n_pad = a_hat.shape[0]
    cin = h.shape[1]
    cout = w.shape[1]
    grid = (n_pad // tm, n_pad // tk)
    return pl.pallas_call(
        gcn_layer_kernel,
        out_shape=jax.ShapeDtypeStruct((n_pad, cout), out_dtype),
        grid_spec=pltpu.PrefetchScalarGridSpec(
            num_scalar_prefetch=0,
            grid=grid,
            in_specs=[
                pl.BlockSpec((tm, tk), lambda i, k: (i, k)),       # A_hat tile
                pl.BlockSpec((tk, cin), lambda i, k: (k, 0)),      # H slab
                pl.BlockSpec((cin, cout), lambda i, k: (0, 0)),    # W (resident)
                pl.BlockSpec((1, cout), lambda i, k: (0, 0)),      # b (resident)
            ],
            out_specs=pl.BlockSpec((tm, cout), lambda i, k: (i, 0)),
            scratch_shapes=[pltpu.VMEM((tm, cin), jnp.float32)],
        ),
        compiler_params=pltpu.CompilerParams(
            dimension_semantics=("parallel", "arbitrary"),
            vmem_limit_bytes=_VMEM_LIMIT,
        ),
    )(a_hat, h, w, b)


def _gcn_layer_head_call(a_hat, h1, w2, b2, w3, b3, *, tm, tk):
    n_pad = a_hat.shape[0]
    hid = h1.shape[1]
    grid = (n_pad // tm, n_pad // tk)
    return pl.pallas_call(
        gcn_layer_head_kernel,
        out_shape=jax.ShapeDtypeStruct((n_pad, 1), jnp.float32),
        grid_spec=pltpu.PrefetchScalarGridSpec(
            num_scalar_prefetch=0,
            grid=grid,
            in_specs=[
                pl.BlockSpec((tm, tk), lambda i, k: (i, k)),       # A_hat tile
                pl.BlockSpec((tk, hid), lambda i, k: (k, 0)),      # h1 slab
                pl.BlockSpec((hid, hid), lambda i, k: (0, 0)),     # W2
                pl.BlockSpec((1, hid), lambda i, k: (0, 0)),       # b2
                pl.BlockSpec((hid, 1), lambda i, k: (0, 0)),       # W3
                pl.BlockSpec(memory_space=pltpu.MemorySpace.SMEM), # b3 scalar
            ],
            out_specs=pl.BlockSpec((tm, 1), lambda i, k: (i, 0)),
            scratch_shapes=[pltpu.VMEM((tm, hid), jnp.float32)],
        ),
        compiler_params=pltpu.CompilerParams(
            dimension_semantics=("parallel", "arbitrary"),
            vmem_limit_bytes=_VMEM_LIMIT,
        ),
    )(a_hat, h1, w2, b2, w3, b3)


# ----------------------------------------------------------------------------
# Graph glue (plain JAX) + forward
# ----------------------------------------------------------------------------
def gcn_normalized_adjacency(edge_index, num_nodes):
    """Dense D^{-1/2}(A + I)D^{-1/2}, matching PyG GCNConv (gcn_norm).

    Duplicate (parallel) edges accumulate; existing self-loops are replaced by
    exactly one unit self-loop per node (add_remaining_self_loops semantics).
    A[dst, src] = weight for every edge src -> dst (flow='source_to_target').
    """
    row, col = edge_index[0], edge_index[1]
    a = jnp.zeros((num_nodes, num_nodes), jnp.float32).at[col, row].add(1.0)
    eye = jnp.eye(num_nodes, dtype=jnp.float32)
    a = a * (1.0 - eye) + eye
    deg = jnp.sum(a, axis=1)
    d_inv_sqrt = jnp.where(deg > 0, jax.lax.rsqrt(deg), 0.0)
    return d_inv_sqrt[:, None] * a * d_inv_sqrt[None, :]


def _round_up(n, m):
    return ((n + m - 1) // m) * m


def _choose_tiles(n):
    """Pick (n_pad, tm, tk) so tiles obey the (8,128) rule and fit VMEM."""
    if n <= 1024:
        n_pad = _round_up(n, 8)
        return n_pad, n_pad, n_pad          # single full-array tile
    tile = 512                              # bf16 (512,512) A tile = 512 KiB
    n_pad = _round_up(n, tile)
    return n_pad, tile, tile


def gnn_forward(x, edge_index, edge_attr, params):
    # edge_attr is accepted but unused, matching the reference forward()
    # (GCNConv is called without edge_weight).
    del edge_attr
    n, f = x.shape
    w1, b1, w2, b2, w3, b3 = params
    hid = w1.shape[1]

    # TODO(synk): for genuinely sparse graphs a CSR + scalar-prefetch gather
    # kernel would avoid the dense O(N^2) adjacency entirely.
    a_hat = gcn_normalized_adjacency(edge_index, n)

    n_pad, tm, tk = _choose_tiles(n)
    a_pad = jnp.zeros((n_pad, n_pad), jnp.bfloat16).at[:n, :n].set(
        a_hat.astype(jnp.bfloat16))
    x_pad = jnp.zeros((n_pad, f), jnp.bfloat16).at[:n, :].set(
        x.astype(jnp.bfloat16))

    w1_b = w1.astype(jnp.bfloat16)
    w2_b = w2.astype(jnp.bfloat16)
    w3_b = w3.astype(jnp.bfloat16)
    b1_f = b1.reshape(1, hid).astype(jnp.float32)
    b2_f = b2.reshape(1, hid).astype(jnp.float32)
    b3_f = b3.reshape(-1).astype(jnp.float32)   # (1,) SMEM scalar

    # Layer 1: h1 = relu((A_hat @ X) @ W1 + b1)   [reordered: F < hidden]
    h1 = _gcn_layer_call(a_pad, x_pad, w1_b, b1_f, tm=tm, tk=tk,
                         out_dtype=jnp.bfloat16)
    # Dropout(p=0.5): inference mode -> identity.
    # TODO(synk): training-mode dropout would use pltpu.prng_seed +
    #             pltpu.stateful_bernoulli; omitted for eval semantics.

    # Layer 2 + fused head: out = relu((A_hat @ h1) @ W2 + b2) @ W3 + b3
    out = _gcn_layer_head_call(a_pad, h1, w2_b, b2_f, w3_b, b3_f, tm=tm, tk=tk)
    return out[:n]


def init_params(key, num_features, hidden_channels):
    k1, k2, k3 = jax.random.split(key, 3)
    w1 = jax.random.normal(k1, (num_features, hidden_channels), jnp.float32)
    w1 = w1 * jnp.sqrt(2.0 / (num_features + hidden_channels))
    b1 = jnp.zeros((1, hidden_channels), jnp.float32)
    w2 = jax.random.normal(k2, (hidden_channels, hidden_channels), jnp.float32)
    w2 = w2 * jnp.sqrt(2.0 / (2 * hidden_channels))
    b2 = jnp.zeros((1, hidden_channels), jnp.float32)
    w3 = jax.random.normal(k3, (hidden_channels, 1), jnp.float32)
    w3 = w3 * jnp.sqrt(1.0 / hidden_channels)
    b3 = jnp.zeros((1,), jnp.float32)
    return (w1, b1, w2, b2, w3, b3)


if __name__ == "__main__":
    num_nodes = 8
    num_features = 4
    hidden_channels = 32
    num_edges = 16

    key = jax.random.PRNGKey(0)
    kx, ke, ka, kp = jax.random.split(key, 4)

    x = jax.random.normal(kx, (num_nodes, num_features), jnp.float32)
    edge_index = jax.random.randint(ke, (2, num_edges), 0, num_nodes,
                                    dtype=jnp.int32)
    edge_attr = jax.random.normal(ka, (num_edges, 1), jnp.float32)  # unused

    params = init_params(kp, num_features, hidden_channels)

    out = gnn_forward(x, edge_index, edge_attr, params)
    out = jax.block_until_ready(out)
    assert out.shape == (num_nodes, 1)
    print("KERNEL_OK")
</pallas_src>

<mosaic_0001>
module attributes {stable_mosaic.version = 11 : i64} {
  func.func @gcn_layer_kernel(%arg0: i32, %arg1: i32, %arg2: memref<8x8xbf16, #tpu.memory_space<vmem>>, %arg3: memref<8x4xbf16, #tpu.memory_space<vmem>>, %arg4: memref<4x32xbf16, #tpu.memory_space<vmem>>, %arg5: memref<1x32xf32, #tpu.memory_space<vmem>>, %arg6: memref<8x32xbf16, #tpu.memory_space<vmem>>, %arg7: memref<8x4xf32, #tpu.memory_space<vmem>>) attributes {dimension_semantics = [#tpu.dimension_semantics<parallel>, #tpu.dimension_semantics<arbitrary>], iteration_bounds = array<i64: 1, 1>, scalar_prefetch = 0 : i64, scratch_operands = 1 : i64, tpu.core_type = #tpu.core_type<tc>, window_params = [{transform_indices = @transform_0, window_bounds = array<i64: 8, 8>}, {transform_indices = @transform_1, window_bounds = array<i64: 8, 4>}, {pipeline_mode = #tpu.pipeline_mode<synchronous>, transform_indices = @transform_2, window_bounds = array<i64: 4, 32>}, {pipeline_mode = #tpu.pipeline_mode<synchronous>, transform_indices = @transform_3, window_bounds = array<i64: 1, 32>}, {transform_indices = @transform_4, window_bounds = array<i64: 8, 32>}]} {
    %c0_i32 = arith.constant 0 : i32
    %0 = arith.cmpi eq, %arg1, %c0_i32 : i32
    %1 = arith.extui %0 : i1 to i32
    %c0_i32_0 = arith.constant 0 : i32
    %2 = arith.cmpi ne, %1, %c0_i32_0 : i32
    scf.if %2 {
      %cst_10 = arith.constant 0.000000e+00 : f32
      %12 = vector.broadcast %cst_10 : f32 to vector<8x4xf32>
      %c0_11 = arith.constant 0 : index
      %c0_12 = arith.constant 0 : index
      %13 = vector.load %arg7[%c0_11, %c0_12] : memref<8x4xf32, #tpu.memory_space<vmem>>, vector<8x4xf32>
      tpu.vector_store %arg7[%c0_11, %c0_12], %12 {strides = array<i32>} : memref<8x4xf32, #tpu.memory_space<vmem>>, vector<8x4xf32>,
    } else {
    }
    %c0 = arith.constant 0 : index
    %c0_1 = arith.constant 0 : index
    %3 = vector.load %arg7[%c0, %c0_1] : memref<8x4xf32, #tpu.memory_space<vmem>>, vector<8x4xf32>
    %c0_2 = arith.constant 0 : index
    %c0_3 = arith.constant 0 : index
    %4 = vector.load %arg2[%c0_2, %c0_3] : memref<8x8xbf16, #tpu.memory_space<vmem>>, vector<8x8xbf16>
    %c0_4 = arith.constant 0 : index
    %c0_5 = arith.constant 0 : index
    %5 = vector.load %arg3[%c0_4, %c0_5] : memref<8x4xbf16, #tpu.memory_space<vmem>>, vector<8x4xbf16>
    %cst = arith.constant dense<0.000000e+00> : vector<8x4xf32>
    %6 = tpu.matmul %4, %5, %cst {dimension_numbers = #tpu.dot_dimension_numbers<[1], [0], [0], [1], [0, 0, 1, 1], [], []>} : vector<8x8xbf16>, vector<8x4xbf16>, vector<8x4xf32> -> vector<8x4xf32>
    %7 = arith.addf %3, %6 : vector<8x4xf32>
    %c0_6 = arith.constant 0 : index
    %c0_7 = arith.constant 0 : index
    %8 = vector.load %arg7[%c0_6, %c0_7] : memref<8x4xf32, #tpu.memory_space<vmem>>, vector<8x4xf32>
    tpu.vector_store %arg7[%c0_6, %c0_7], %7 {strides = array<i32>} : memref<8x4xf32, #tpu.memory_space<vmem>>, vector<8x4xf32>,
    %c0_i32_8 = arith.constant 0 : i32
    %9 = arith.cmpi eq, %arg1, %c0_i32_8 : i32
    %10 = arith.extui %9 : i1 to i32
    %c0_i32_9 = arith.constant 0 : i32
    %11 = arith.cmpi ne, %10, %c0_i32_9 : i32
    scf.if %11 {
      %c0_10 = arith.constant 0 : index
      %c0_11 = arith.constant 0 : index
      %12 = vector.load %arg7[%c0_10, %c0_11] : memref<8x4xf32, #tpu.memory_space<vmem>>, vector<8x4xf32>
      %13 = arith.truncf %12 : vector<8x4xf32> to vector<8x4xbf16>
      %c0_12 = arith.constant 0 : index
      %c0_13 = arith.constant 0 : index
      %14 = vector.load %arg4[%c0_12, %c0_13] : memref<4x32xbf16, #tpu.memory_space<vmem>>, vector<4x32xbf16>
      %cst_14 = arith.constant dense<0.000000e+00> : vector<8x32xf32>
      %15 = tpu.matmul %13, %14, %cst_14 {dimension_numbers = #tpu.dot_dimension_numbers<[1], [0], [0], [1], [0, 0, 1, 1], [], []>} : vector<8x4xbf16>, vector<4x32xbf16>, vector<8x32xf32> -> vector<8x32xf32>
      %c0_15 = arith.constant 0 : index
      %c0_16 = arith.constant 0 : index
      %16 = vector.load %arg5[%c0_15, %c0_16] : memref<1x32xf32, #tpu.memory_space<vmem>>, vector<1x32xf32>
      %17 = vector.broadcast %16 : vector<1x32xf32> to vector<8x32xf32>
      %18 = arith.addf %15, %17 : vector<8x32xf32>
      %cst_17 = arith.constant 0.000000e+00 : f32
      %19 = vector.broadcast %cst_17 : f32 to vector<8x32xf32>
      %20 = arith.maximumf %18, %19 : vector<8x32xf32>
      %21 = arith.truncf %20 : vector<8x32xf32> to vector<8x32xbf16>
      %c0_18 = arith.constant 0 : index
      %c0_19 = arith.constant 0 : index
      %22 = vector.load %arg6[%c0_18, %c0_19] : memref<8x32xbf16, #tpu.memory_space<vmem>>, vector<8x32xbf16>
      tpu.vector_store %arg6[%c0_18, %c0_19], %21 {strides = array<i32>} : memref<8x32xbf16, #tpu.memory_space<vmem>>, vector<8x32xbf16>,
    } else {
    }
    return
  }
  func.func @transform_0(%arg0: i32, %arg1: i32) -> (i32, i32) {
    %c0_i32 = arith.constant 0 : i32
    return %arg0, %arg1 : i32, i32
  }
  func.func @transform_1(%arg0: i32, %arg1: i32) -> (i32, i32) {
    %c0_i32 = arith.constant 0 : i32
    %c0_i32_0 = arith.constant 0 : i32
    return %arg1, %c0_i32 : i32, i32
  }
  func.func @transform_2(%arg0: i32, %arg1: i32) -> (i32, i32) {
    %c0_i32 = arith.constant 0 : i32
    %c0_i32_0 = arith.constant 0 : i32
    %c0_i32_1 = arith.constant 0 : i32
    return %c0_i32, %c0_i32_0 : i32, i32
  }
  func.func @transform_3(%arg0: i32, %arg1: i32) -> (i32, i32) {
    %c0_i32 = arith.constant 0 : i32
    %c0_i32_0 = arith.constant 0 : i32
    %c0_i32_1 = arith.constant 0 : i32
    return %c0_i32, %c0_i32_0 : i32, i32
  }
  func.func @transform_4(%arg0: i32, %arg1: i32) -> (i32, i32) {
    %c0_i32 = arith.constant 0 : i32
    %c0_i32_0 = arith.constant 0 : i32
    return %arg0, %c0_i32 : i32, i32
  }
}

</mosaic_0001>

<bundles_post_ra>
// kernel: tpu_custom_call.1
= control target key start
LH: loop header
LB: loop body
LE: loop exit
PB: predicated region body
PF: predicated region fallthrough
CT: control target
= control target key end

     0   :  { %vm32_vm0 = vcmask 1043456   ;;  %v203_v1 = vmov 0.0   ;;  %vm204_vm1 = vmmov 0   ;;  %vm23_vm2 = vcmask 31744   ;;  %s258_s0 = inlined_call_operand.vmem [shape: bf16[8,8], index: 0, kind: input, shape index: {}]   ;;  %s259_s1 = inlined_call_operand.vmem [shape: bf16[8,4], index: 1, kind: input, shape index: {}]   ;;  %s260_s2 = inlined_call_operand.vmem [shape: bf16[4,32], index: 2, kind: input, shape index: {}]   ;;  %s261_s3 = inlined_call_operand.vmem [shape: f32[1,32], index: 3, kind: input, shape index: {}]   ;;  %s262_s4 = inlined_call_operand.hbm [shape: bf16[8,32], index: 4, kind: output, shape index: {}]  }
   0x1   :  { %v27_v0 = vld [vmem:[%s259_s1] sm:$0xf]  ;;  %164 = vmatprep.subr.bf16.mxu0 %v203_v1  ;;  %166 = vmatprep.mubr.msk.bf16.mxu0 %vm204_vm1, %v203_v1 }
   0x2   :  { %v34_v2 = vsel %vm32_vm0, %v27_v0, 0 }
   0x3   :  { %9 = vsyncpa [#allocation4], 0  ;;  %165 = vmatpush3.bf16.msra.mxu0 %v34_v2  ;;  %v26_v3 = vld [vmem:[%s258_s0] sm:$0xf]  ;;  %vm28_vm3 = vcmask 64512   ;;  %24 = vst.msk [vmem:[#allocation2] sm:$0xff] %vm23_vm2, %v203_v1  ;;  %170 = vmatprep.subr.bf16.mxu1 %v203_v1 }
   0x4   :  { %172 = vmatprep.mubr.msk.bf16.mxu1 %vm204_vm1, %v203_v1  ;;  %v84_v4 = vld [vmem:[%s260_s2] sm:$0x3]  ;;  %vm95_vm4 = vcmask 1041408   ;;  %s205_s2 = smov [#allocation3]   ;;  %vm141_vm5 = vcmask 257024  }
   0x5   :  { %v97_v5 = vsel %vm95_vm4, %v84_v4, 0  ;;  %v158_v14 = vld [vmem:[%s261_s3] ss:$0 sm:$0xff]  ;;  %s149_s21 = sshll.u32 %s205_s2, 4  ;;  %s150_s21 = int_to_ptr.vmem [resolvable:$true] %s149_s21 }
   0x6   :  { %167 = vmatmul.mubr.msk.bf16.vlgmr.msra.gmra.mrb[0].mxu0 %vm28_vm3, %v26_v3  ;;  %171 = vmatpush3.bf16.msra.mxu1 %v97_v5  ;;  %s179_s22 = scalar_lea.vmem %s150_s21, 64  ;;  %p184_p1 = scmp.lt.s32.totalorder %s150_s21, %s150_s21 }
   0x7   :  { %p180_p0 = scmp.ne.s32.totalorder %s150_s21, %s179_s22  ;;  %p185_p2 = scmp.lt.s32.totalorder %s179_s22, %s179_s22 }
   0x9   :  { %p186_p3 = por %p185_p2, %p184_p1 }
   0xa   :  { %v25_v6 = vld [vmem:[#allocation2] sm:$0xff] }
   0xb   :  { %p187_p4 = pnand %p186_p3, %p180_p0 }
  0xd9   :  { %v70_v7 = vpop.f32.mrb[0].mxu0 }
  0xda   :  { %v76_v8 = vadd.f32 %v70_v7, %v25_v6  ;;  %v168_v9 = vpop.f32.mrb[1].mxu0 }
  0xdb   :  { %v73_v10 = vpop.f32.mrb[2].mxu0 }
  0xdc   :  { %78 = vst.msk [vmem:[#allocation2] sm:$0xff] %vm23_vm2, %v76_v8  ;;  %v169_v11 = vpop.f32.mrb[3].mxu0 }
  0xe3   :  { %v82_v12 = vld [vmem:[#allocation2] sm:$0xff] }
  0xe4   :  { %v83_v13 = vpack.c.bf16 %v82_v12, %v82_v12 }
  0xe6   :  { %173 = vmatmul.mubr.msk.bf16.vlgmr.msra.gmra.mrb[0].mxu1 %vm23_vm2, %v83_v13 }
 0x1b9   :  { %v133_v15 = vpop.f32.mrb[0].mxu1 }
 0x1ba   :  { %v134_v16 = vadd.f32 %v158_v14, %v133_v15  ;;  %v174_v17 = vpop.f32.mrb[1].mxu1 }
 0x1bb   :  { %v136_v18 = vpop.f32.mrb[2].mxu1 }
 0x1bc   :  { %v139_v19 = vmax.f32 %v134_v16, 0.0  ;;  %v175_v20 = vpop.f32.mrb[3].mxu1 }
 0x1be   :  { %v140_v21 = vpack.c.bf16 %v139_v19, %v139_v19 }
 0x1c0   :  { %142 = vst.msk [vmem:[#allocation3] sm:$0xf] %vm141_vm5, %v140_v21 }
 0x1c1   :  { %190 = shalt.err (!%p187_p4)
}
 0x1c2   :  { %s191_s24 = scalar_lea.hbm %s262_s4, 64 }
 0x1c3   :  { %p192_p5 = scmp.ne.s32.totalorder %s262_s4, %s191_s24  ;;  %p195_p6 = scmp.lt.u32.totalorder %s191_s24, %s262_s4 }
 0x1c5   :  { %p197_p7 = pnand %p195_p6, %p192_p5 }
 0x1c7   :  { %200 = shalt.err (!%p197_p7)
}
 0x1c8   :  { %152 = dma.vmem_to_hbm [thread:$0]  %s150_s21, 64, %s262_s4, [#allocation4]  }
 0x1c9   :  { %201 = dma.done.wait [#allocation4], 64  }
 0x1ca   :  { %202 = vsyncadd [#allocation4], 4294967232 }
 0x1cb   :  { %156 = vsyncpa [#allocation4], 1 }

</bundles_post_ra>
